<compile_context>
chip_gen: v6e
topology: v6e:2x2x1
jax: 0.10.0
libtpu: 0.0.40
codegen_flags: <defaults>
</compile_context>

<pallas_src>
import jax
import jax.numpy as jnp
import numpy as np
from jax.experimental import pallas as pl
from jax.experimental.pallas import tpu as pltpu


_MAX_TILE_ROWS = 1024   # 1024 rows x 128 lanes (f32: 512 KiB per input buffer)
_PAD_XS = 0.0           # padded p: log clamp * t==0 -> zero BCE / IoU contribution
_PAD_XT = -50.0         # 0.5*tanh(-25)+0.5 == 0 exactly in f32 -> t == 0


def _cdiv(a: int, b: int) -> int:
    return -(-a // b)


def _round_up(x: int, m: int) -> int:
    return _cdiv(x, m) * m


def _sublane_multiple(dtype) -> int:
    # f32 -> 8, bf16 -> 16, int8/fp8 -> 32 (packed sublanes)
    return max(8, 32 // jnp.dtype(dtype).itemsize)


def _pick_tiling(rows_total: int, n_split: int, cap: int, sub: int):
    """Choose (tile_rows, nk_split, padded_rows) for the lane-row reduction axis."""
    cap = max(sub, (cap // sub) * sub)
    target = _cdiv(rows_total, n_split)          # rows handled per reduction split
    if target <= cap:
        tile_rows = _round_up(target, sub)
    else:
        tile_rows = 0
        # Prefer a divisor so no padding is needed at all.
        for r in range(cap, sub - 1, -sub):
            if rows_total % (r * n_split) == 0:
                tile_rows = r
                break
        if tile_rows == 0:                       # no convenient divisor: pad the tail
            tile_rows = cap
    nk_split = _cdiv(rows_total, tile_rows * n_split)
    padded_rows = nk_split * n_split * tile_rows
    return tile_rows, nk_split, padded_rows


def _adaptation_loss_kernel(xs_ref, xt1_ref, acc_ref):
    # xs_ref/xt1_ref: (1, tile_rows, 128) block of one sample (native dtype).
    # acc_ref: (1, 3, 8, 128) f32 per-(split, sample) accumulator block
    #          (rows: bce, intersection, t+p). Resident across the k axis.
    k = pl.program_id(2)

    @pl.when(k == 0)
    def _init():
        acc_ref[...] = jnp.zeros_like(acc_ref)

    # Cast in-register; inputs stream from HBM in their native dtype.
    p = xs_ref[0].astype(jnp.float32)                              # (tile_rows, 128)
    # sigmoid via a single EUP tanh (instead of exp + reciprocal/divide).
    t = 0.5 * jnp.tanh(0.5 * xt1_ref[0].astype(jnp.float32)) + 0.5

    # BCE (nn.BCELoss: log clamped at -100).
    log_p = jnp.maximum(jnp.log(p), -100.0)
    log_1mp = jnp.maximum(jnp.log(1.0 - p), -100.0)
    bce = -(t * log_p + (1.0 - t) * log_1mp)

    tr = p.shape[0]

    def _fold(x):
        # (tile_rows, 128) -> (8, 128): sublane-aligned vreg adds only (pure VPU,
        # no XLU). The cross-sublane/lane reduce is deferred to the JAX epilogue.
        return jnp.sum(x.reshape(tr // 8, 8, 128), axis=0)

    acc_ref[0, 0] += _fold(bce)        # per-(sublane, lane) BCE partial sums
    acc_ref[0, 1] += _fold(t * p)      # intersection partial sums
    acc_ref[0, 2] += _fold(t + p)      # (t + p) partial sums (union = this - inter)


def adaptation_loss(x_s, x_t1, x_t2=None, *, max_tile_rows=_MAX_TILE_ROWS):
    """Pallas implementation of Adaptation_loss.forward(x_s, x_t1, x_t2)."""
    del x_t2  # unused by the reference module's forward pass
    B = x_s.shape[0]
    N = int(np.prod(x_s.shape[1:]))   # C*H*W

    rows_total = _cdiv(N, 128)
    sub = max(_sublane_multiple(x_s.dtype), _sublane_multiple(x_t1.dtype))
    # 2-way reduction split so an odd / batch-1 call still fills both v7x cores.
    n_split = 2 if (B % 2 == 1 and rows_total >= 2 * sub) else 1
    tile_rows, nk_split, padded_rows = _pick_tiling(
        rows_total, n_split, max_tile_rows, sub)
    padded_n = padded_rows * 128

    xs = x_s.reshape(B, N)
    xt = x_t1.reshape(B, N)
    if padded_n != N:
        # Pad with values whose BCE / IoU contributions are exactly zero.
        xs = jnp.pad(xs, ((0, 0), (0, padded_n - N)), constant_values=_PAD_XS)
        xt = jnp.pad(xt, ((0, 0), (0, padded_n - N)), constant_values=_PAD_XT)
    xs3 = xs.reshape(B, padded_rows, 128)
    xt3 = xt.reshape(B, padded_rows, 128)

    bytes_in = B * padded_n * (jnp.dtype(x_s.dtype).itemsize
                               + jnp.dtype(x_t1.dtype).itemsize)
    cost = pl.CostEstimate(flops=12 * B * padded_n,
                           transcendentals=3 * B * padded_n,  # tanh + 2 logs
                           bytes_accessed=bytes_in + n_split * B * 3 * 8 * 128 * 4)

    acc = pl.pallas_call(
        _adaptation_loss_kernel,
        out_shape=jax.ShapeDtypeStruct((n_split * B, 3, 8, 128), jnp.float32),
        grid=(n_split, B, nk_split),
        in_specs=[
            pl.BlockSpec((1, tile_rows, 128),
                         lambda s, b, k: (b, s * nk_split + k, 0)),
            pl.BlockSpec((1, tile_rows, 128),
                         lambda s, b, k: (b, s * nk_split + k, 0)),
        ],
        out_specs=pl.BlockSpec((1, 3, 8, 128),
                               lambda s, b, k: (s * B + b, 0, 0, 0)),
        compiler_params=pltpu.CompilerParams(
            dimension_semantics=("parallel", "parallel", "arbitrary"),
            vmem_limit_bytes=32 * 1024 * 1024),
        cost_estimate=cost,
    )(xs3, xt3)

    # Trivial O(B) epilogue: finish the cross-sublane/lane reductions + divides.
    per_sample = acc.reshape(n_split, B, 3, 8 * 128).sum(axis=(0, 3))   # (B, 3)
    bce_sum = per_sample[:, 0]
    inter = per_sample[:, 1]
    union = per_sample[:, 2] - inter
    bce_loss = jnp.sum(bce_sum) / float(N)        # sum over batch of per-sample means
    iou_loss = jnp.mean(1.0 - inter / union)      # pytorch_iou.IOU(size_average=True)
    return bce_loss + iou_loss


def adaptation_loss_ref(x_s, x_t1, x_t2=None):
    """Pure-JAX reference mirroring the PyTorch semantics."""
    del x_t2
    B = x_s.shape[0]
    p = x_s.reshape(B, -1).astype(jnp.float32)
    t = jax.nn.sigmoid(x_t1.reshape(B, -1).astype(jnp.float32))
    bce = -(t * jnp.maximum(jnp.log(p), -100.0)
            + (1.0 - t) * jnp.maximum(jnp.log(1.0 - p), -100.0))
    bce_loss = jnp.sum(jnp.mean(bce, axis=1))
    inter = jnp.sum(t * p, axis=1)
    union = jnp.sum(t, axis=1) + jnp.sum(p, axis=1) - inter
    iou_loss = jnp.mean(1.0 - inter / union)
    return bce_loss + iou_loss


if __name__ == "__main__":
    root = jax.random.PRNGKey(0)

    def run_case(case_key, shape, **kw):
        k1, k2, k3 = jax.random.split(case_key, 3)
        # x_s must be a probability map in (0, 1) for BCELoss -> build via sigmoid.
        x_s = jax.nn.sigmoid(jax.random.normal(k1, shape, jnp.float32))
        x_t1 = jax.random.normal(k2, shape, jnp.float32)   # teacher logits
        x_t2 = jax.random.normal(k3, shape, jnp.float32)   # unused by forward
        out = adaptation_loss(x_s, x_t1, x_t2, **kw)
        jax.block_until_ready(out)
        ref = adaptation_loss_ref(x_s, x_t1, x_t2)
        assert np.allclose(np.asarray(out), np.asarray(ref),
                           rtol=1e-4, atol=1e-5), (shape, kw, float(out), float(ref))

    keys = jax.random.split(root, 3)
    # Typical saliency-map call: single big tile per sample, no padding.
    run_case(keys[0], (2, 1, 128, 128))
    # Forced small tile: exercises the multi-step accumulate/finalize path.
    run_case(keys[1], (2, 1, 128, 128), max_tile_rows=32)
    # Batch-1, awkward spatial size: exercises zero-contribution padding and the
    # 2-way reduction split (v7x megacore path).
    run_case(keys[2], (1, 1, 96, 100))

    print("KERNEL_OK")
</pallas_src>

<mosaic_0001>
module attributes {stable_mosaic.version = 11 : i64} {
  func.func @_adaptation_loss_kernel(%arg0: i32, %arg1: i32, %arg2: i32, %arg3: memref<1x128x128xf32, #tpu.memory_space<vmem>>, %arg4: memref<1x128x128xf32, #tpu.memory_space<vmem>>, %arg5: memref<1x3x8x128xf32, #tpu.memory_space<vmem>>) attributes {dimension_semantics = [#tpu.dimension_semantics<parallel>, #tpu.dimension_semantics<parallel>, #tpu.dimension_semantics<arbitrary>], iteration_bounds = array<i64: 1, 2, 1>, scalar_prefetch = 0 : i64, scratch_operands = 0 : i64, tpu.core_type = #tpu.core_type<tc>, window_params = [{transform_indices = @transform_0, window_bounds = array<i64: 1, 128, 128>}, {transform_indices = @transform_1, window_bounds = array<i64: 1, 128, 128>}, {transform_indices = @transform_2, window_bounds = array<i64: 1, 3, 8, 128>}]} {
    %c0_i32 = arith.constant 0 : i32
    %0 = arith.cmpi eq, %arg2, %c0_i32 : i32
    %1 = arith.extui %0 : i1 to i32
    %c0_i32_0 = arith.constant 0 : i32
    %2 = arith.cmpi ne, %1, %c0_i32_0 : i32
    scf.if %2 {
      %cst_38 = arith.constant 0.000000e+00 : f32
      %55 = vector.broadcast %cst_38 : f32 to vector<1x3x8x128xf32>
      %c0_39 = arith.constant 0 : index
      %c0_40 = arith.constant 0 : index
      %c0_41 = arith.constant 0 : index
      %c0_42 = arith.constant 0 : index
      %56 = vector.load %arg5[%c0_39, %c0_40, %c0_41, %c0_42] : memref<1x3x8x128xf32, #tpu.memory_space<vmem>>, vector<1x3x8x128xf32>
      tpu.vector_store %arg5[%c0_39, %c0_40, %c0_41, %c0_42], %55 {strides = array<i32>} : memref<1x3x8x128xf32, #tpu.memory_space<vmem>>, vector<1x3x8x128xf32>,
    } else {
    }
    %c0 = arith.constant 0 : index
    %c0_1 = arith.constant 0 : index
    %c0_2 = arith.constant 0 : index
    %3 = vector.load %arg3[%c0, %c0_1, %c0_2] : memref<1x128x128xf32, #tpu.memory_space<vmem>>, vector<1x128x128xf32>
    %4 = vector.shape_cast %3 : vector<1x128x128xf32> to vector<128x128xf32>
    %c0_3 = arith.constant 0 : index
    %c0_4 = arith.constant 0 : index
    %c0_5 = arith.constant 0 : index
    %5 = vector.load %arg4[%c0_3, %c0_4, %c0_5] : memref<1x128x128xf32, #tpu.memory_space<vmem>>, vector<1x128x128xf32>
    %6 = vector.shape_cast %5 : vector<1x128x128xf32> to vector<128x128xf32>
    %cst = arith.constant 5.000000e-01 : f32
    %7 = vector.broadcast %cst : f32 to vector<128x128xf32>
    %8 = arith.mulf %7, %6 : vector<128x128xf32>
    %9 = math.tanh %8 : vector<128x128xf32>
    %cst_6 = arith.constant 5.000000e-01 : f32
    %10 = vector.broadcast %cst_6 : f32 to vector<128x128xf32>
    %11 = arith.mulf %10, %9 : vector<128x128xf32>
    %cst_7 = arith.constant 5.000000e-01 : f32
    %12 = vector.broadcast %cst_7 : f32 to vector<128x128xf32>
    %13 = arith.addf %11, %12 : vector<128x128xf32>
    %14 = math.log %4 : vector<128x128xf32>
    %cst_8 = arith.constant -1.000000e+02 : f32
    %15 = vector.broadcast %cst_8 : f32 to vector<128x128xf32>
    %16 = arith.maximumf %14, %15 : vector<128x128xf32>
    %cst_9 = arith.constant 1.000000e+00 : f32
    %17 = vector.broadcast %cst_9 : f32 to vector<128x128xf32>
    %18 = arith.subf %17, %4 : vector<128x128xf32>
    %19 = math.log %18 : vector<128x128xf32>
    %cst_10 = arith.constant -1.000000e+02 : f32
    %20 = vector.broadcast %cst_10 : f32 to vector<128x128xf32>
    %21 = arith.maximumf %19, %20 : vector<128x128xf32>
    %22 = arith.mulf %13, %16 : vector<128x128xf32>
    %cst_11 = arith.constant 1.000000e+00 : f32
    %23 = vector.broadcast %cst_11 : f32 to vector<128x128xf32>
    %24 = arith.subf %23, %13 : vector<128x128xf32>
    %25 = arith.mulf %24, %21 : vector<128x128xf32>
    %26 = arith.addf %22, %25 : vector<128x128xf32>
    %cst_12 = arith.constant 0.000000e+00 : f32
    %27 = vector.broadcast %cst_12 : f32 to vector<128x128xf32>
    %28 = arith.subf %27, %26 : vector<128x128xf32>
    %c0_13 = arith.constant 0 : index
    %c0_14 = arith.constant 0 : index
    %c0_15 = arith.constant 0 : index
    %c0_16 = arith.constant 0 : index
    %29 = vector.load %arg5[%c0_13, %c0_14, %c0_15, %c0_16] : memref<1x3x8x128xf32, #tpu.memory_space<vmem>>, vector<1x1x8x128xf32>
    %30 = vector.shape_cast %29 : vector<1x1x8x128xf32> to vector<8x128xf32>
    %31 = vector.shape_cast %28 : vector<128x128xf32> to vector<16x8x128xf32>
    %cst_17 = arith.constant dense<0.000000e+00> : vector<8x128xf32>
    %32 = vector.multi_reduction <add>, %31, %cst_17 [0] : vector<16x8x128xf32> to vector<8x128xf32>
    %33 = arith.addf %30, %32 : vector<8x128xf32>
    %c0_18 = arith.constant 0 : index
    %c0_19 = arith.constant 0 : index
    %c0_20 = arith.constant 0 : index
    %c0_21 = arith.constant 0 : index
    %34 = vector.load %arg5[%c0_18, %c0_19, %c0_20, %c0_21] : memref<1x3x8x128xf32, #tpu.memory_space<vmem>>, vector<1x1x8x128xf32>
    %35 = vector.shape_cast %34 : vector<1x1x8x128xf32> to vector<8x128xf32>
    %36 = vector.shape_cast %33 : vector<8x128xf32> to vector<1x1x8x128xf32>
    tpu.vector_store %arg5[%c0_18, %c0_19, %c0_20, %c0_21], %36 {strides = array<i32>} : memref<1x3x8x128xf32, #tpu.memory_space<vmem>>, vector<1x1x8x128xf32>,
    %c0_22 = arith.constant 0 : index
    %c1 = arith.constant 1 : index
    %c0_23 = arith.constant 0 : index
    %c0_24 = arith.constant 0 : index
    %37 = vector.load %arg5[%c0_22, %c1, %c0_23, %c0_24] : memref<1x3x8x128xf32, #tpu.memory_space<vmem>>, vector<1x1x8x128xf32>
    %38 = vector.shape_cast %37 : vector<1x1x8x128xf32> to vector<8x128xf32>
    %39 = arith.mulf %13, %4 : vector<128x128xf32>
    %40 = vector.shape_cast %39 : vector<128x128xf32> to vector<16x8x128xf32>
    %cst_25 = arith.constant dense<0.000000e+00> : vector<8x128xf32>
    %41 = vector.multi_reduction <add>, %40, %cst_25 [0] : vector<16x8x128xf32> to vector<8x128xf32>
    %42 = arith.addf %38, %41 : vector<8x128xf32>
    %c0_26 = arith.constant 0 : index
    %c1_27 = arith.constant 1 : index
    %c0_28 = arith.constant 0 : index
    %c0_29 = arith.constant 0 : index
    %43 = vector.load %arg5[%c0_26, %c1_27, %c0_28, %c0_29] : memref<1x3x8x128xf32, #tpu.memory_space<vmem>>, vector<1x1x8x128xf32>
    %44 = vector.shape_cast %43 : vector<1x1x8x128xf32> to vector<8x128xf32>
    %45 = vector.shape_cast %42 : vector<8x128xf32> to vector<1x1x8x128xf32>
    tpu.vector_store %arg5[%c0_26, %c1_27, %c0_28, %c0_29], %45 {strides = array<i32>} : memref<1x3x8x128xf32, #tpu.memory_space<vmem>>, vector<1x1x8x128xf32>,
    %c0_30 = arith.constant 0 : index
    %c2 = arith.constant 2 : index
    %c0_31 = arith.constant 0 : index
    %c0_32 = arith.constant 0 : index
    %46 = vector.load %arg5[%c0_30, %c2, %c0_31, %c0_32] : memref<1x3x8x128xf32, #tpu.memory_space<vmem>>, vector<1x1x8x128xf32>
    %47 = vector.shape_cast %46 : vector<1x1x8x128xf32> to vector<8x128xf32>
    %48 = arith.addf %13, %4 : vector<128x128xf32>
    %49 = vector.shape_cast %48 : vector<128x128xf32> to vector<16x8x128xf32>
    %cst_33 = arith.constant dense<0.000000e+00> : vector<8x128xf32>
    %50 = vector.multi_reduction <add>, %49, %cst_33 [0] : vector<16x8x128xf32> to vector<8x128xf32>
    %51 = arith.addf %47, %50 : vector<8x128xf32>
    %c0_34 = arith.constant 0 : index
    %c2_35 = arith.constant 2 : index
    %c0_36 = arith.constant 0 : index
    %c0_37 = arith.constant 0 : index
    %52 = vector.load %arg5[%c0_34, %c2_35, %c0_36, %c0_37] : memref<1x3x8x128xf32, #tpu.memory_space<vmem>>, vector<1x1x8x128xf32>
    %53 = vector.shape_cast %52 : vector<1x1x8x128xf32> to vector<8x128xf32>
    %54 = vector.shape_cast %51 : vector<8x128xf32> to vector<1x1x8x128xf32>
    tpu.vector_store %arg5[%c0_34, %c2_35, %c0_36, %c0_37], %54 {strides = array<i32>} : memref<1x3x8x128xf32, #tpu.memory_space<vmem>>, vector<1x1x8x128xf32>,
    return
  }
  func.func @transform_0(%arg0: i32, %arg1: i32, %arg2: i32) -> (i32, i32, i32) {
    %c1_i32 = arith.constant 1 : i32
    %0 = arith.muli %arg0, %c1_i32 : i32
    %1 = arith.addi %0, %arg2 : i32
    %c0_i32 = arith.constant 0 : i32
    %c0_i32_0 = arith.constant 0 : i32
    return %arg1, %1, %c0_i32 : i32, i32, i32
  }
  func.func @transform_1(%arg0: i32, %arg1: i32, %arg2: i32) -> (i32, i32, i32) {
    %c1_i32 = arith.constant 1 : i32
    %0 = arith.muli %arg0, %c1_i32 : i32
    %1 = arith.addi %0, %arg2 : i32
    %c0_i32 = arith.constant 0 : i32
    %c0_i32_0 = arith.constant 0 : i32
    return %arg1, %1, %c0_i32 : i32, i32, i32
  }
  func.func @transform_2(%arg0: i32, %arg1: i32, %arg2: i32) -> (i32, i32, i32, i32) {
    %c2_i32 = arith.constant 2 : i32
    %0 = arith.muli %arg0, %c2_i32 : i32
    %1 = arith.addi %0, %arg1 : i32
    %c0_i32 = arith.constant 0 : i32
    %c0_i32_0 = arith.constant 0 : i32
    %c0_i32_1 = arith.constant 0 : i32
    %c0_i32_2 = arith.constant 0 : i32
    return %1, %c0_i32, %c0_i32_0, %c0_i32_1 : i32, i32, i32, i32
  }
}

</mosaic_0001>

<bundles_post_ra>
// kernel: tpu_custom_call.1
= control target key start
LH: loop header
LB: loop body
LE: loop exit
PB: predicated region body
PF: predicated region fallthrough
CT: control target
= control target key end

     0   :  { %7 = vsyncpa [#allocation3], 0  ;;  %s1617_s0 = inlined_call_operand.hbm [shape: f32[2,128,128], index: 0, kind: input, shape index: {}]   ;;  %s1618_s1 = inlined_call_operand.hbm [shape: f32[2,128,128], index: 1, kind: input, shape index: {}]   ;;  %s1619_s2 = inlined_call_operand.hbm [shape: f32[2,3,8,128], index: 2, kind: output, shape index: {}]  }
   0x1   :  { %9 = vsyncpa [#allocation3 + $0x1], 0 }
   0x2   :  { %10 = vsyncpa [#allocation6], 0 }
   0x3   :  { %12 = vsyncpa [#allocation6 + $0x1], 0 }
   0x4   :  { %13 = vsyncpa [#allocation4], 0 }
   0x5   :  { %15 = vsyncpa [#allocation4 + $0x1], 0  ;;  %s1117_s9 = smov 0   ;;  %s1119_s10 = smov 0  }
   0x6   :  { %s1121_s11 = smov 0   ;;  %s1123_s12 = smov 0  }
   0x7   :  { %s1125_s13 = smov 0   ;;  %s1127_s14 = smov 0  }
   0x8 LB: > { %s761_s15 = sadd.s32 4294967295, %s1093_s14   ;;  %s762_s16 = sadd.s32 4294967294, %s1093_s14   ;;  %s1093_s14 = sphi %s1127_s14, %s21_s14   ;;  %s1089_s13 = sphi %s1125_s13, %s1701_s13   ;;  %s1085_s12 = sphi %s1123_s12, %s1700_s12   ;;  %s1081_s11 = sphi %s1121_s11, %s1699_s11   ;;  %s1077_s10 = sphi %s1119_s10, %s1698_s10   ;;  %s1073_s9 = sphi %s1117_s9, %s1697_s9  }
   0x9   : > { %s36_s17 = sadd.s32 1, %s1089_s13  ;;  %s51_s18 = sadd.s32 1, %s1081_s11 }
   0xa   : > { %p38_p0 = scmp.ge.s32.totalorder %s36_s17, 2  ;;  %p58_p1 = scmp.ne.s32.totalorder %s1081_s11, %s1077_s10 }
   0xb   : > { %p59_p2 = scmp.eq.s32.totalorder %s1093_s14, 0  ;;  %p64_p3 = scmp.ne.s32.totalorder %s1077_s10, %s1073_s9 }
   0xc   : > { %s1703_s17 = smov (%p38_p0, %s36_s17), 0  ;;  %p65_p5 = scmp.eq.s32.totalorder %s761_s15, 0 }
   0xd   : > { %p1158_p4 = por %p59_p2, %p58_p1  ;;  %s46_s20 = ssub.s32 %s1089_s13, %s1703_s17 }
   0xe   : > { %p122_p6 = scmp.eq.s32.totalorder %s761_s15, 1  ;;  %p49_p7 = scmp.eq.s32.totalorder %s46_s20, 0 }
   0xf   : > { %p1164_p8 = por %p65_p5, %p64_p3  ;;  %p128_p10 = scmp.eq.s32.totalorder %s762_s16, 1 }
  0x10   : > { %p1168_p9 = por %p122_p6, %p58_p1  ;;  %p764_p12 = scmp.ge.s32.totalorder %s1093_s14, 2 }
  0x11   : > { %s1173_s23 = scalar_select %p49_p7, %s1081_s11, %s51_s18  }
  0x12   : > { %p1175_p11 = por %p128_p10, %p64_p3  ;;  %p802_p13 = scmp.lt.s32.totalorder %s1093_s14, 2 }
  0x13   : > { %s1182_s25 = sand.u32 1, %s1081_s11   ;;  %s781_s27 = sshll.u32 %s1089_s13, 11 }
  0x14   : > { %s765_s26 = sshll.u32 %s1182_s25, 7  ;;  %s161_s30 = scalar_lea.hbm %s1617_s0, %s781_s27 }
  0x15   : > { %s152_s3 = scalar_lea.vmem [#allocation2], %s765_s26  ;;  %p1195_p0 = pnand %p802_p13, %p1158_p4 }
  0x16   : > { %s162_s4 = sshll.u32 %s152_s3, 4  ;;  %p771_p1 = scmp.ge.s32.totalorder %s1093_s14, 1  ;;  %s163_s4 = int_to_ptr.vmem [resolvable:$true] %s162_s4 }
  0x17   : > { %s149_s6 = scalar_lea.sflag [#allocation3], %s1182_s25  ;;  %p955_p2 = pneg %p1195_p0 }
  0x18   : > { %s966_s7 = scalar_lea.vmem %s163_s4, 2048  ;;  %s1095_s8 = smov [#allocation2]  }
  0x19   : > { %p967_p3 = scmp.ne.s32.totalorder %s163_s4, %s966_s7  ;;  %s971_s15 = sshll.u32 %s1095_s8, 4  ;;  %s972_s15 = int_to_ptr.vmem [resolvable:$false] %s971_s15 }
  0x1a   : > { %s973_s16 = scalar_lea.vmem %s972_s15, 4096  ;;  %p974_p4 = scmp.lt.s32.totalorder %s163_s4, %s972_s15 }
  0x1b   : > { %p969_p5 = pnand %p967_p3, %p955_p2  ;;  %p975_p7 = scmp.lt.s32.totalorder %s973_s16, %s966_s7 }
  0x1d   : > { %p970_p6 = pneg %p969_p5  ;;  %p976_p10 = por %p975_p7, %p974_p4 }
  0x1f   : > { %p977_p13 = pnand %p976_p10, %p970_p6 }
  0x21   : > { %980 = shalt.err (!%p977_p13)
}
  0x22   : > { %s1096_s18 = smov 128   ;;  %s1097_s19 = smov 8  }
  0x23   : > { %794 = dma.hbm_to_vmem [thread:$0]  (!%p1195_p0), %s161_s30, 2048, %s163_s4, %s149_s6, %s1096_s18, %s1096_s18, %s1097_s19  }
  0x24   : > { %p194_p3 = scmp.lt.s32.totalorder %s1093_s14, 3  ;;  %s185_s29 = scalar_lea.hbm %s1618_s1, %s781_s27 }
  0x25   : > { %s176_s7 = scalar_lea.vmem [#allocation5], %s765_s26  ;;  %s173_s15 = scalar_lea.sflag [#allocation6], %s1182_s25 }
  0x26   : > { %p1216_p5 = pnand %p771_p1, %p194_p3  ;;  %s186_s8 = sshll.u32 %s176_s7, 4  ;;  %s187_s8 = int_to_ptr.vmem [resolvable:$true] %s186_s8 }
  0x27   : > { %s994_s16 = scalar_lea.vmem %s187_s8, 2048  ;;  %s1098_s30 = smov [#allocation5]  }
  0x28   : > { %p995_p6 = scmp.ne.s32.totalorder %s187_s8, %s994_s16  ;;  %s999_s4 = sshll.u32 %s1098_s30, 4  ;;  %s1000_s4 = int_to_ptr.vmem [resolvable:$false] %s999_s4 }
  0x29   : > { %s1001_s27 = scalar_lea.vmem %s1000_s4, 4096  ;;  %p1002_p10 = scmp.lt.s32.totalorder %s187_s8, %s1000_s4 }
  0x2a   : > { %p997_p4 = pnand %p995_p6, %p955_p2  ;;  %p1003_p1 = scmp.lt.s32.totalorder %s1001_s27, %s994_s16 }
  0x2c   : > { %p998_p7 = pneg %p997_p4  ;;  %p1004_p13 = por %p1003_p1, %p1002_p10 }
  0x2e   : > { %p1005_p3 = pnand %p1004_p13, %p998_p7 }
  0x30   : > { %1008 = shalt.err (!%p1005_p3)
}
  0x31   : > { %797 = dma.hbm_to_vmem [thread:$0]  (!%p1195_p0), %s185_s29, 2048, %s187_s8, %s173_s15, %s1096_s18, %s1096_s18, %s1097_s19  }
  0x32   : > { %198 = sbr.rel (%p1216_p5) target bundleno = 180 (0xb4), region = 28 }
  0x37   : > { %s1231_s25 = sand.u32 1, %s1077_s10  }
  0x38   : > { %s772_s26 = sshll.u32 %s1231_s25, 7  ;;  %s201_s6 = scalar_lea.sflag [#allocation3], %s1231_s25 }
  0x39   : > { %s1235_s20 = scalar_lea.vmem [#allocation2], %s772_s26 }
  0x3a   : > { %1060 = dma.done.wait (%p1164_p8), %s201_s6, 2048  }
  0x3b   : > { %1062 = vsyncadd (%p1164_p8), %s201_s6, 4294965248  ;;  %s210_s5 = scalar_lea.sflag [#allocation6], %s1231_s25  ;;  %s1242_s18 = scalar_lea.vmem [#allocation5], %s772_s26 }
  0x3c   : > { %1064 = dma.done.wait (%p1164_p8), %s210_s5, 2048  }
  0x3d   : > { %1066 = vsyncadd (%p1164_p8), %s210_s5, 4294965248  ;;  %v1249_v0 = vld [vmem:[%s1235_s20] sm:$0xff]  ;;  %v1252_v1 = vld [vmem:[%s1235_s20 + $0x8] sm:$0xff]  ;;  %s783_s21 = smul.u32 24, %s1231_s25  ;;  %s629_s15 = scalar_lea.sflag [#allocation4], %s1231_s25 }
  0x3e   : > { %857 = vlog2.f32 %v1249_v0  ;;  %v1256_v2 = vld [vmem:[%s1235_s20 + $0x10] sm:$0xff]  ;;  %v268_v3 = vld [vmem:[%s1242_s18] sm:$0xff]  ;;  %v269_v4 = vld [vmem:[%s1242_s18 + $0x8] sm:$0xff]  ;;  %v396_v51 = vsub.f32 1.0, %v1249_v0  ;;  %v397_v55 = vsub.f32 1.0, %v1252_v1  ;;  %s784_s28 = smul.u32 384, %s1085_s12 }
  0x3f   : > { %859 = vlog2.f32 %v1252_v1  ;;  %v1262_v5 = vld [vmem:[%s1235_s20 + $0x18] sm:$0xff]  ;;  %v270_v6 = vld [vmem:[%s1242_s18 + $0x10] sm:$0xff]  ;;  %v1267_v7 = vld [vmem:[%s1235_s20 + $0x20] sm:$0xff]  ;;  %v284_v9 = vmul.f32 0.5, %v268_v3  ;;  %v285_v12 = vmul.f32 0.5, %v269_v4  ;;  %v398_v56 = vsub.f32 1.0, %v1256_v2 }
  0x40   : > { %861 = vlog2.f32 %v1256_v2  ;;  %v271_v8 = vld [vmem:[%s1242_s18 + $0x18] sm:$0xff]  ;;  %v1272_v10 = vld [vmem:[%s1235_s20 + $0x28] sm:$0xff]  ;;  %v272_v11 = vld [vmem:[%s1242_s18 + $0x20] sm:$0xff]  ;;  %v286_v15 = vmul.f32 0.5, %v270_v6  ;;  %v399_v57 = vsub.f32 1.0, %v1262_v5  ;;  %v400_v61 = vsub.f32 1.0, %v1267_v7  ;;  %s1567_s8 = scalar_lea.hbm %s1619_s2, %s784_s28 }
  0x41   : > { %863 = vlog2.f32 %v1262_v5  ;;  %1654 = vst [vmem:[#allocation11_spill] sm:$0xff] %v1272_v10  ;;  %v1277_v13 = vld [vmem:[%s1235_s20 + $0x30] sm:$0xff]  ;;  %v273_v14 = vld [vmem:[%s1242_s18 + $0x28] sm:$0xff]  ;;  %v287_v17 = vmul.f32 0.5, %v271_v8  ;;  %v275_v18 = vld [vmem:[%s1242_s18 + $0x38] sm:$0xff]  ;;  %v288_v19 = vmul.f32 0.5, %v272_v11 }
  0x42   : > { %865 = vlog2.f32 %v1267_v7  ;;  %1655 = vst [vmem:[#allocation12_spill] sm:$0xff] %v1277_v13  ;;  %v274_v16 = vld [vmem:[%s1242_s18 + $0x30] sm:$0xff]  ;;  %v276_v20 = vld [vmem:[%s1242_s18 + $0x40] sm:$0xff]  ;;  %v289_v21 = vmul.f32 0.5, %v273_v14  ;;  %v277_v22 = vld [vmem:[%s1242_s18 + $0x48] sm:$0xff]  ;;  %v291_v25 = vmul.f32 0.5, %v275_v18 }
  0x43   : > { %867 = vlog2.f32 %v1272_v10  ;;  %v290_v23 = vmul.f32 0.5, %v274_v16  ;;  %v278_v24 = vld [vmem:[%s1242_s18 + $0x50] sm:$0xff]  ;;  %v279_v26 = vld [vmem:[%s1242_s18 + $0x58] sm:$0xff]  ;;  %v292_v27 = vmul.f32 0.5, %v276_v20  ;;  %v280_v28 = vld [vmem:[%s1242_s18 + $0x60] sm:$0xff]  ;;  %v293_v29 = vmul.f32 0.5, %v277_v22 }
  0x44   : > { %869 = vlog2.f32 %v1277_v13  ;;  %v281_v31 = vld [vmem:[%s1242_s18 + $0x68] sm:$0xff]  ;;  %v294_v32 = vmul.f32 0.5, %v278_v24  ;;  %v282_v34 = vld [vmem:[%s1242_s18 + $0x70] sm:$0xff]  ;;  %v295_v35 = vmul.f32 0.5, %v279_v26  ;;  %v283_v37 = vld [vmem:[%s1242_s18 + $0x78] sm:$0xff]  ;;  %v296_v38 = vmul.f32 0.5, %v280_v28 }
  0x45   : > { %871 = vtanh.f32 %v284_v9  ;;  %v297_v40 = vmul.f32 0.5, %v281_v31  ;;  %v298_v42 = vmul.f32 0.5, %v282_v34  ;;  %v299_v44 = vmul.f32 0.5, %v283_v37  ;;  %v1293_v48 = vld [vmem:[%s1235_s20 + $0x38] sm:$0xff]  ;;  %v1296_v49 = vld [vmem:[%s1235_s20 + $0x40] sm:$0xff]  ;;  %v1299_v50 = vld [vmem:[%s1235_s20 + $0x48] sm:$0xff] }
  0x46   : > { %873 = vtanh.f32 %v285_v12  ;;  %1656 = vst [vmem:[#allocation13_spill] sm:$0xff] %v1293_v48  ;;  %1657 = vst [vmem:[#allocation14_spill] sm:$0xff] %v1296_v49  ;;  %v1303_v53 = vld [vmem:[%s1235_s20 + $0x50] sm:$0xff]  ;;  %v1306_v54 = vld [vmem:[%s1235_s20 + $0x58] sm:$0xff]  ;;  %v401_v62 = vsub.f32 1.0, %v1272_v10  ;;  %v402_v63 = vsub.f32 1.0, %v1277_v13 }
  0x47   : > { %875 = vtanh.f32 %v286_v15  ;;  %1658 = vst [vmem:[#allocation15_spill] sm:$0xff] %v1299_v50  ;;  %1659 = vst [vmem:[#allocation16_spill] sm:$0xff] %v1303_v53  ;;  %v1312_v59 = vld [vmem:[%s1235_s20 + $0x60] sm:$0xff]  ;;  %v1315_v60 = vld [vmem:[%s1235_s20 + $0x68] sm:$0xff]  ;;  %v403_v6 = vsub.f32 1.0, %v1293_v48  ;;  %v404_v8 = vsub.f32 1.0, %v1296_v49 }
  0x48   : > { %877 = vtanh.f32 %v287_v17  ;;  %1660 = vst [vmem:[#allocation17_spill] sm:$0xff] %v1306_v54  ;;  %1661 = vst [vmem:[#allocation18_spill] sm:$0xff] %v1312_v59  ;;  %v1322_v4 = vld [vmem:[%s1235_s20 + $0x70] sm:$0xff]  ;;  %v405_v9 = vsub.f32 1.0, %v1299_v50  ;;  %v1329_v12 = vld [vmem:[%s1235_s20 + $0x78] sm:$0xff]  ;;  %v406_v15 = vsub.f32 1.0, %v1303_v53 }
  0x49   : > { %879 = vtanh.f32 %v288_v19  ;;  %1662 = vst [vmem:[#allocation19_spill] sm:$0xff] %v1315_v60  ;;  %1663 = vst [vmem:[#allocation20_spill] sm:$0xff] %v1322_v4  ;;  %s238_s19 = scalar_lea.vmem [#allocation7], %s783_s21  ;;  %s1099_s12 = smov [#allocation7]  }
  0x4a   : > { %881 = vtanh.f32 %v289_v21  ;;  %1664 = vst [vmem:[#allocation21_spill] sm:$0xff] %v1329_v12  ;;  %s644_s29 = sshll.u32 %s238_s19, 4  ;;  %s1013_s30 = sshll.u32 %s1099_s12, 4  ;;  %s1569_s29 = int_to_ptr.vmem [resolvable:$true] %s644_s29  ;;  %s1014_s30 = int_to_ptr.vmem [resolvable:$false] %s1013_s30 }
  0x4b   : > { %v858_v30 = vpop.eup %857  ;;  %883 = vtanh.f32 %v290_v23  ;;  %s1009_s16 = scalar_lea.vmem %s1569_s29, 384  ;;  %s1015_s4 = scalar_lea.vmem %s1014_s30, 768 }
  0x4c   : > { %v860_v33 = vpop.eup %859  ;;  %885 = vtanh.f32 %v291_v25  ;;  %v349_v14 = vmul.f32 0.6931472, %v858_v30  ;;  %p1010_p8 = scmp.ne.s32.totalorder %s1569_s29, %s1009_s16  ;;  %p1016_p5 = scmp.lt.s32.totalorder %s1569_s29, %s1014_s30 }
  0x4d   : > { %v862_v36 = vpop.eup %861  ;;  %887 = vtanh.f32 %v292_v27  ;;  %v351_v18 = vmul.f32 0.6931472, %v860_v33  ;;  %p1017_p6 = scmp.lt.s32.totalorder %s1015_s4, %s1009_s16 }
  0x4e   : > { %v864_v39 = vpop.eup %863  ;;  %889 = vtanh.f32 %v293_v29  ;;  %v353_v22 = vmul.f32 0.6931472, %v862_v36  ;;  %p1011_p0 = pnand %p1010_p8, %p1168_p9 }
  0x4f   : > { %v866_v41 = vpop.eup %865  ;;  %891 = vtanh.f32 %v294_v32  ;;  %v355_v23 = vmul.f32 0.6931472, %v864_v39  ;;  %v380_v32 = vmax.f32 %v349_v14, -100.0  ;;  %v381_v36 = vmax.f32 %v351_v18, -100.0  ;;  %p1018_p4 = por %p1017_p6, %p1016_p5 }
  0x50   : > { %v868_v43 = vpop.eup %867  ;;  %893 = vtanh.f32 %v295_v35  ;;  %v357_v26 = vmul.f32 0.6931472, %v866_v41  ;;  %v382_v39 = vmax.f32 %v353_v22, -100.0  ;;  %p1012_p2 = pneg %p1011_p0 }
  0x51   : > { %v870_v45 = vpop.eup %869  ;;  %895 = vtanh.f32 %v296_v38  ;;  %v359_v27 = vmul.f32 0.6931472, %v868_v43 }
  0x52   : > { %v872_v46 = vpop.eup %871  ;;  %897 = vtanh.f32 %v297_v40  ;;  %v361_v31 = vmul.f32 0.6931472, %v870_v45  ;;  %v383_v40 = vmax.f32 %v355_v23, -100.0  ;;  %v384_v43 = vmax.f32 %v357_v26, -100.0  ;;  %p1019_p7 = pnand %p1018_p4, %p1012_p2 }
  0x53   : > { %v874_v47 = vpop.eup %873  ;;  %899 = vtanh.f32 %v298_v42  ;;  %v316_v30 = vmul.f32 0.5, %v872_v46 }
  0x54   : > { %v876_v52 = vpop.eup %875  ;;  %901 = vtanh.f32 %v299_v44  ;;  %v317_v34 = vmul.f32 0.5, %v874_v47  ;;  %v385_v44 = vmax.f32 %v359_v27, -100.0  ;;  %v386_v47 = vmax.f32 %v361_v31, -100.0 }
  0x55   : > { %v878_v58 = vpop.eup %877  ;;  %903 = vlog2.f32 %v1293_v48  ;;  %v318_v35 = vmul.f32 0.5, %v876_v52  ;;  %v1342_v14 = vadd.f32 0.5, %v316_v30 }
  0x56   : > { %v880_v3 = vpop.eup %879  ;;  %905 = vlog2.f32 %v1296_v49  ;;  %v319_v38 = vmul.f32 0.5, %v878_v58 }
  0x57   : > { %v882_v11 = vpop.eup %881  ;;  %907 = vlog2.f32 %v1299_v50  ;;  %v320_v42 = vmul.f32 0.5, %v880_v3  ;;  %v1347_v58 = vadd.f32 0.5, %v318_v35 }
  0x58   : > { %v884_v17 = vpop.eup %883  ;;  %909 = vlog2.f32 %v1303_v53  ;;  %v321_v45 = vmul.f32 0.5, %v882_v11  ;;  %v1351_v22 = vadd.f32 0.5, %v319_v38 }
  0x59   : > { %v886_v21 = vpop.eup %885  ;;  %911 = vlog2.f32 %v1306_v54  ;;  %v322_v52 = vmul.f32 0.5, %v884_v17  ;;  %v1357_v26 = vadd.f32 0.5, %v320_v42  ;;  %v1369_v30 = vmul.f32 %v382_v39, %v1347_v58 }
  0x5a   : > { %v888_v25 = vpop.eup %887  ;;  %913 = vlog2.f32 %v1312_v59  ;;  %v323_v18 = vmul.f32 0.5, %v886_v21  ;;  %v1364_v21 = vadd.f32 0.5, %v321_v45 }
  0x5b   : > { %v890_v29 = vpop.eup %889  ;;  %915 = vlog2.f32 %v396_v51  ;;  %v324_v23 = vmul.f32 0.5, %v888_v25 }
  0x5c   : > { %v892_v33 = vpop.eup %891  ;;  %917 = vlog2.f32 %v397_v55  ;;  %v1345_v55 = vadd.f32 0.5, %v317_v34  ;;  %v325_v27 = vmul.f32 0.5, %v890_v29  ;;  %v1371_v34 = vadd.f32 0.5, %v322_v52 }
  0x5d   : > { %v894_v37 = vpop.eup %893  ;;  %919 = vlog2.f32 %v1315_v60  ;;  %v326_v25 = vmul.f32 0.5, %v892_v33  ;;  %v1376_v38 = vadd.f32 0.5, %v323_v18  ;;  %v1379_v29 = vmul.f32 %v384_v43, %v1357_v26 }
  0x5e   : > { %v896_v41 = vpop.eup %895  ;;  %921 = vlog2.f32 %v398_v56  ;;  %v1355_v56 = vmul.f32 %v380_v32, %v1342_v14  ;;  %v1362_v17 = vmul.f32 %v381_v36, %v1345_v55  ;;  %v327_v32 = vmul.f32 0.5, %v894_v37 }
  0x5f   : > { %v898_v46 = vpop.eup %897  ;;  %923 = vlog2.f32 %v1322_v4  ;;  %v328_v36 = vmul.f32 0.5, %v896_v41  ;;  %v1384_v45 = vadd.f32 0.5, %v324_v23  ;;  %v1389_v33 = vmul.f32 %v386_v47, %v1371_v34 }
  0x60   : > { %v900_v51 = vpop.eup %899  ;;  %925 = vlog2.f32 %v399_v57  ;;  %v329_v42 = vmul.f32 0.5, %v898_v46  ;;  %v1391_v41 = vadd.f32 0.5, %v325_v27  ;;  %v476_v43 = vsub.f32 1.0, %v1342_v14 }
  0x61   : > { %v902_v3 = vpop.eup %901  ;;  %927 = vlog2.f32 %v1329_v12  ;;  %v1396_v46 = vadd.f32 0.5, %v326_v25  ;;  %v1398_v18 = vadd.f32 0.5, %v327_v32  ;;  %v1401_v47 = vadd.f32 0.5, %v328_v36 }
  0x62   : > { %v904_v11 = vpop.eup %903  ;;  %929 = vlog2.f32 %v400_v61  ;;  %v1374_v61 = vmul.f32 %v383_v40, %v1351_v22  ;;  %v330_v40 = vmul.f32 0.5, %v900_v51  ;;  %v331_v52 = vmul.f32 0.5, %v902_v3 }
  0x63   : > { %v906_v57 = vpop.eup %905  ;;  %931 = vlog2.f32 %v401_v62  ;;  %v1382_v62 = vmul.f32 %v385_v44, %v1364_v21  ;;  %1665 = vst [vmem:[#allocation22_spill] sm:$0xff] %v1398_v18  ;;  %1666 = vst [vmem:[#allocation23_spill] sm:$0xff] %v1401_v47  ;;  %v363_v28 = vmul.f32 0.6931472, %v904_v11  ;;  %v478_v51 = vsub.f32 1.0, %v1347_v58 }
  0x64   : > { %v908_v31 = vpop.eup %907  ;;  %933 = vlog2.f32 %v402_v63  ;;  %v477_v63 = vsub.f32 1.0, %v1345_v55  ;;  %v1406_v27 = vadd.f32 0.5, %v329_v42  ;;  %v365_v24 = vmul.f32 0.6931472, %v906_v57 }
  0x65   : > { %v910_v35 = vpop.eup %909  ;;  %935 = vlog2.f32 %v403_v6  ;;  %v1410_v20 = vadd.f32 0.5, %v330_v40  ;;  %v367_v19 = vmul.f32 0.6931472, %v908_v31  ;;  %v1415_v36 = vadd.f32 0.5, %v331_v52 }
  0x66   : > { %v912_v39 = vpop.eup %911  ;;  %937 = vlog2.f32 %v404_v8  ;;  %1667 = vst [vmem:[#allocation24_spill] sm:$0xff] %v1406_v27  ;;  %v369_v3 = vmul.f32 0.6931472, %v910_v35  ;;  %v387_v25 = vmax.f32 %v363_v28, -100.0  ;;  %v388_v50 = vmax.f32 %v365_v24, -100.0 }
  0x67   : > { %v914_v37 = vpop.eup %913  ;;  %939 = vlog2.f32 %v405_v9  ;;  %v1668_v11 = vsub.f32 1.0, %v1306_v54  ;;  %v389_v53 = vmax.f32 %v367_v19, -100.0 }
  0x68   : > { %v916_v44 = vpop.eup %915  ;;  %941 = vlog2.f32 %v406_v15  ;;  %v373_v48 = vmul.f32 0.6931472, %v914_v37  ;;  %v1669_v15 = vsub.f32 1.0, %v1312_v59  ;;  %v390_v52 = vmax.f32 %v369_v3, -100.0 }
  0x69   : > { %v918_v23 = vpop.eup %917  ;;  %v413_v16 = vmul.f32 0.6931472, %v916_v44  ;;  %943 = vlog2.f32 %v1668_v11  ;;  %v1429_v11 = vmul.f32 %v387_v25, %v1376_v38  ;;  %v1432_v19 = vmul.f32 %v388_v50, %v1384_v45 }
  0x6a   : > { %v920_v6 = vpop.eup %919  ;;  %v415_v42 = vmul.f32 0.6931472, %v918_v23  ;;  %v371_v23 = vmul.f32 0.6931472, %v912_v39  ;;  %945 = vlog2.f32 %v1669_v15  ;;  %v1672_v3 = vsub.f32 1.0, %v1329_v12 }
  0x6b   : > { %v922_v32 = vpop.eup %921  ;;  %v375_v35 = vmul.f32 0.6931472, %v920_v6  ;;  %v444_v13 = vmax.f32 %v413_v16, -100.0  ;;  %v392_v6 = vmax.f32 %v373_v48, -100.0  ;;  %v1671_v16 = vsub.f32 1.0, %v1322_v4 }
  0x6c   : > { %v924_v8 = vpop.eup %923  ;;  %v417_v9 = vmul.f32 0.6931472, %v922_v32  ;;  %v445_v31 = vmax.f32 %v415_v42, -100.0  ;;  %v1670_v32 = vsub.f32 1.0, %v1315_v60  ;;  %v391_v59 = vmax.f32 %v371_v23, -100.0 }
  0x6d   : > { %v926_v57 = vpop.eup %925  ;;  %v377_v10 = vmul.f32 0.6931472, %v924_v8  ;;  %v393_v8 = vmax.f32 %v375_v35, -100.0  ;;  %v1439_v50 = vmul.f32 %v389_v53, %v1391_v41  ;;  %v1442_v23 = vmul.f32 %v390_v52, %v1396_v46 }
  0x6e   : > { %v928_v49 = vpop.eup %927  ;;  %v419_v40 = vmul.f32 0.6931472, %v926_v57  ;;  %947 = vlog2.f32 %v1670_v32  ;;  %v446_v37 = vmax.f32 %v417_v9, -100.0  ;;  %v492_v32 = vmul.f32 %v476_v43, %v444_v13 }
  0x6f   : > { %v930_v44 = vpop.eup %929  ;;  %v379_v24 = vmul.f32 0.6931472, %v928_v49  ;;  %949 = vlog2.f32 %v1671_v16  ;;  %v493_v60 = vmul.f32 %v477_v63, %v445_v31  ;;  %v394_v25 = vmax.f32 %v377_v10, -100.0 }
  0x70   : > { %v932_v28 = vpop.eup %931  ;;  %v421_v39 = vmul.f32 0.6931472, %v930_v44  ;;  %v447_v42 = vmax.f32 %v419_v40, -100.0  ;;  %951 = vlog2.f32 %v1672_v3  ;;  %v1445_v13 = vmul.f32 %v391_v59, %v1398_v18 }
  0x71   : > { %v934_v15 = vpop.eup %933  ;;  %v423_v57 = vmul.f32 0.6931472, %v932_v28  ;;  %v395_v54 = vmax.f32 %v379_v24, -100.0  ;;  %v494_v28 = vmul.f32 %v478_v51, %v446_v37  ;;  %v1448_v10 = vmul.f32 %v392_v6, %v1401_v47 }
  0x72   : > { %v936_v49 = vpop.eup %935  ;;  %v425_v44 = vmul.f32 0.6931472, %v934_v15  ;;  %v448_v48 = vmax.f32 %v421_v39, -100.0  ;;  %v1451_v63 = vmul.f32 %v393_v8, %v1406_v27  ;;  %v1673_v53 = vsub.f32 1.0, %v1351_v22 }
  0x73   : > { %v938_v9 = vpop.eup %937  ;;  %v427_v16 = vmul.f32 0.6931472, %v936_v49  ;;  %v449_v35 = vmax.f32 %v423_v57, -100.0  ;;  %v508_v31 = vadd.f32 %v492_v32, %v1355_v56  ;;  %v509_v52 = vadd.f32 %v493_v60, %v1362_v17 }
  0x74   : > { %v940_v43 = vpop.eup %939  ;;  %v495_v40 = vmul.f32 %v1673_v53, %v447_v42  ;;  %v429_v24 = vmul.f32 0.6931472, %v938_v9  ;;  %v1458_v39 = vmul.f32 %v394_v25, %v1410_v20  ;;  %v1461_v59 = vmul.f32 %v395_v54, %v1415_v36 }
  0x75   : > { %v942_v51 = vpop.eup %941  ;;  %v485_v37 = vsub.f32 1.0, %v1391_v41  ;;  %v450_v15 = vmax.f32 %v425_v44, -100.0  ;;  %v486_v6 = vsub.f32 1.0, %v1396_v46  ;;  %v1675_v57 = vsub.f32 1.0, %v1357_v26 }
  0x76   : > { %1674 = vst [vmem:[#allocation25_spill] sm:$0xff] %v1461_v59  ;;  %v510_v56 = vadd.f32 %v494_v28, %v1369_v30  ;;  %v944_v8 = vpop.eup %943  ;;  %v431_v60 = vmul.f32 0.6931472, %v940_v43  ;;  %v451_v17 = vmax.f32 %v427_v16, -100.0  ;;  %v487_v42 = vsub.f32 1.0, %v1398_v18 }
  0x77   : > { %v496_v49 = vmul.f32 %v1675_v57, %v448_v48  ;;  %v1676_v32 = vsub.f32 1.0, %v1364_v21  ;;  %v946_v54 = vpop.eup %945  ;;  %v433_v3 = vmul.f32 0.6931472, %v942_v51  ;;  %v511_v9 = vadd.f32 %v495_v40, %v1374_v61 }
  0x78   : > { %v524_v44 = vsub.f32 0.0, %v508_v31  ;;  %v525_v53 = vsub.f32 0.0, %v509_v52  ;;  %v452_v12 = vmax.f32 %v429_v24, -100.0  ;;  %v488_v4 = vsub.f32 1.0, %v1401_v47 }
  0x79   : > { %v497_v25 = vmul.f32 %v1676_v32, %v449_v35  ;;  %v489_v48 = vsub.f32 1.0, %v1406_v27  ;;  %v435_v16 = vmul.f32 0.6931472, %v944_v8  ;;  %v1677_v43 = vsub.f32 1.0, %v1371_v34 }
  0x7a   : > { %v512_v35 = vadd.f32 %v496_v49, %v1379_v29  ;;  %v526_v32 = vsub.f32 0.0, %v510_v56  ;;  %v437_v51 = vmul.f32 0.6931472, %v946_v54  ;;  %v453_v18 = vmax.f32 %v431_v60, -100.0 }
  0x7b   : > { %v948_v28 = vpop.eup %947  ;;  %v498_v57 = vmul.f32 %v1677_v43, %v450_v15  ;;  %v1678_v40 = vsub.f32 1.0, %v1376_v38  ;;  %v454_v24 = vmax.f32 %v433_v3, -100.0  ;;  %v513_v27 = vadd.f32 %v497_v25, %v1382_v62 }
  0x7c   : > { %v950_v52 = vpop.eup %949  ;;  %v527_v30 = vsub.f32 0.0, %v511_v9  ;;  %v541_v47 = vadd.f32 %v525_v53, %v524_v44  ;;  %v439_v8 = vmul.f32 0.6931472, %v948_v28  ;;  %v1679_v59 = vsub.f32 1.0, %v1384_v45 }
  0x7d   : > { %v499_v31 = vmul.f32 %v1678_v40, %v451_v17  ;;  %v560_v29 = vmul.f32 %v1342_v14, %v1249_v0  ;;  %v561_v49 = vmul.f32 %v1345_v55, %v1252_v1  ;;  %v952_v56 = vpop.eup %951  ;;  %v455_v60 = vmax.f32 %v435_v16, -100.0 }
  0x7e   : > { %v500_v15 = vmul.f32 %v1679_v59, %v452_v12  ;;  %v514_v17 = vadd.f32 %v498_v57, %v1389_v33  ;;  %v528_v54 = vsub.f32 0.0, %v512_v35  ;;  %v542_v3 = vadd.f32 %v541_v47, %v526_v32 }
  0x7f   : > { %v441_v43 = vmul.f32 0.6931472, %v950_v52  ;;  %v456_v62 = vmax.f32 %v437_v51, -100.0  ;;  %v501_v25 = vmul.f32 %v485_v37, %v453_v18  ;;  %v562_v9 = vmul.f32 %v1347_v58, %v1256_v2 }
  0x80   : > { %v502_v44 = vmul.f32 %v486_v6, %v454_v24  ;;  %v515_v12 = vadd.f32 %v499_v31, %v1429_v11  ;;  %v529_v59 = vsub.f32 0.0, %v513_v27  ;;  %v543_v53 = vadd.f32 %v542_v3, %v527_v30  ;;  %v1680_v31 = vld [vmem:[#allocation11_spill] sm:$0xff] }
  0x81   : > { %v443_v28 = vmul.f32 0.6931472, %v952_v56  ;;  %v457_v40 = vmax.f32 %v439_v8, -100.0  ;;  %v563_v16 = vmul.f32 %v1351_v22, %v1262_v5  ;;  %v576_v61 = vadd.f32 %v561_v49, %v560_v29 }
  0x82   : > { %v503_v33 = vmul.f32 %v487_v42, %v455_v60  ;;  %v516_v47 = vadd.f32 %v500_v15, %v1432_v19  ;;  %v530_v57 = vsub.f32 0.0, %v514_v17  ;;  %v544_v35 = vadd.f32 %v543_v53, %v528_v54  ;;  %v1681_v15 = vld [vmem:[#allocation12_spill] sm:$0xff]  ;;  %v1682_v17 = vld [vmem:[#allocation13_spill] sm:$0xff] }
  0x83   : > { %v564_v18 = vmul.f32 %v1357_v26, %v1267_v7  ;;  %v577_v37 = vadd.f32 %v576_v61, %v562_v9  ;;  %v595_v11 = vadd.f32 %v1342_v14, %v1249_v0  ;;  %v596_v27 = vadd.f32 %v1345_v55, %v1252_v1 }
  0x84   : > { %v458_v6 = vmax.f32 %v441_v43, -100.0  ;;  %v517_v30 = vadd.f32 %v501_v25, %v1439_v50  ;;  %v531_v32 = vsub.f32 0.0, %v515_v12  ;;  %v545_v51 = vadd.f32 %v544_v35, %v529_v59  ;;  %v1687_v35 = vld [vmem:[#allocation16_spill] sm:$0xff] }
  0x85   : > { %v504_v42 = vmul.f32 %v488_v4, %v456_v62  ;;  %v565_v19 = vmul.f32 %v1364_v21, %v1680_v31  ;;  %v578_v52 = vadd.f32 %v577_v37, %v563_v16  ;;  %v597_v24 = vadd.f32 %v1347_v58, %v1256_v2 }
  0x86   : > { %v459_v61 = vmax.f32 %v443_v28, -100.0  ;;  %v518_v8 = vadd.f32 %v502_v44, %v1442_v23  ;;  %v532_v0 = vsub.f32 0.0, %v516_v47  ;;  %v546_v14 = vadd.f32 %v545_v51, %v530_v57  ;;  %v1686_v28 = vld [vmem:[#allocation15_spill] sm:$0xff]  ;;  %v1689_v51 = vld [vmem:[#allocation17_spill] sm:$0xff] }
  0x87   : > { %v566_v1 = vmul.f32 %v1371_v34, %v1681_v15  ;;  %v579_v55 = vadd.f32 %v578_v52, %v564_v18  ;;  %v598_v50 = vadd.f32 %v1351_v22, %v1262_v5  ;;  %v611_v4 = vadd.f32 %v596_v27, %v595_v11  ;;  %v1688_v27 = vld [vmem:[#allocation25_spill] sm:$0xff] }
  0x88   : > { %v505_v29 = vmul.f32 %v489_v48, %v457_v40  ;;  %v519_v49 = vadd.f32 %v503_v33, %v1445_v13  ;;  %v533_v56 = vsub.f32 0.0, %v517_v30  ;;  %v547_v60 = vadd.f32 %v546_v14, %v531_v32  ;;  %v1684_v48 = vld [vmem:[#allocation14_spill] sm:$0xff] }
  0x89   : > { %v567_v2 = vmul.f32 %v1376_v38, %v1682_v17  ;;  %v580_v58 = vadd.f32 %v579_v55, %v565_v19  ;;  %v599_v23 = vadd.f32 %v1357_v26, %v1267_v7  ;;  %v612_v54 = vadd.f32 %v611_v4, %v597_v24  ;;  %v1694_v4 = vld [vmem:[#allocation24_spill] sm:$0xff] }
  0x8a   : > { %v1683_v3 = vsub.f32 1.0, %v1410_v20  ;;  %v520_v62 = vadd.f32 %v504_v42, %v1448_v10  ;;  %v534_v5 = vsub.f32 0.0, %v518_v8  ;;  %v548_v22 = vadd.f32 %v547_v60, %v532_v0  ;;  %v1692_v8 = vld [vmem:[#allocation23_spill] sm:$0xff] }
  0x8b   : > { %v568_v13 = vmul.f32 %v1384_v45, %v1684_v48  ;;  %v581_v25 = vadd.f32 %v580_v58, %v566_v1  ;;  %v600_v9 = vadd.f32 %v1364_v21, %v1680_v31  ;;  %v613_v44 = vadd.f32 %v612_v54, %v598_v50  ;;  %v1693_v50 = vld [vmem:[#allocation19_spill] sm:$0xff] }
  0x8c   : > { %v506_v43 = vmul.f32 %v1683_v3, %v458_v6  ;;  %v1685_v12 = vsub.f32 1.0, %v1415_v36  ;;  %v521_v7 = vadd.f32 %v505_v29, %v1451_v63  ;;  %v535_v26 = vsub.f32 0.0, %v519_v49  ;;  %v1696_v3 = vld [vmem:[#allocation21_spill] sm:$0xff] }
  0x8d   : > { %v549_v53 = vadd.f32 %v548_v22, %v533_v56  ;;  %v569_v10 = vmul.f32 %v1391_v41, %v1686_v28  ;;  %v582_v40 = vadd.f32 %v581_v25, %v567_v2  ;;  %v601_v16 = vadd.f32 %v1371_v34, %v1681_v15  ;;  %v1690_v34 = vld [vmem:[#allocation22_spill] sm:$0xff] }
  0x8e   : > { %v507_v59 = vmul.f32 %v1685_v12, %v459_v61  ;;  %v614_v33 = vadd.f32 %v613_v44, %v599_v23  ;;  %v522_v47 = vadd.f32 %v506_v43, %v1458_v39  ;;  %v536_v57 = vsub.f32 0.0, %v520_v62  ;;  %v1691_v61 = vld [vmem:[#allocation18_spill] sm:$0xff] }
  0x8f   : > { %v550_v21 = vadd.f32 %v549_v53, %v534_v5  ;;  %v570_v18 = vmul.f32 %v1396_v46, %v1687_v35  ;;  %v583_v37 = vadd.f32 %v582_v40, %v568_v13  ;;  %v602_v63 = vadd.f32 %v1376_v38, %v1682_v17  ;;  %v1695_v17 = vld [vmem:[#allocation20_spill] sm:$0xff] }
  0x90   : > { %v615_v11 = vadd.f32 %v614_v33, %v600_v9  ;;  %v523_v6 = vadd.f32 %v507_v59, %v1688_v27  ;;  %v537_v30 = vsub.f32 0.0, %v521_v7  ;;  %v571_v42 = vmul.f32 %v1690_v34, %v1689_v51 }
  0x91   : > { %v551_v32 = vadd.f32 %v550_v21, %v535_v26  ;;  %v584_v31 = vadd.f32 %v583_v37, %v569_v10  ;;  %v603_v39 = vadd.f32 %v1384_v45, %v1684_v48  ;;  %v538_v52 = vsub.f32 0.0, %v522_v47 }
  0x92   : > { %v616_v19 = vadd.f32 %v615_v11, %v601_v16  ;;  %v572_v0 = vmul.f32 %v1692_v8, %v1691_v61  ;;  %v604_v14 = vadd.f32 %v1391_v41, %v1686_v28  ;;  %v539_v1 = vsub.f32 0.0, %v523_v6 }
  0x93   : > { %v552_v24 = vadd.f32 %v551_v32, %v536_v57  ;;  %v585_v38 = vadd.f32 %v584_v31, %v570_v18  ;;  %v573_v29 = vmul.f32 %v1694_v4, %v1693_v50  ;;  %v605_v45 = vadd.f32 %v1396_v46, %v1687_v35 }
  0x94   : > { %v617_v15 = vadd.f32 %v616_v19, %v602_v63  ;;  %v574_v2 = vmul.f32 %v1410_v20, %v1695_v17  ;;  %v606_v41 = vadd.f32 %v1690_v34, %v1689_v51  ;;  %v575_v43 = vmul.f32 %v1415_v36, %v1696_v3 }
  0x95   : > { %v553_v55 = vadd.f32 %v552_v24, %v537_v30  ;;  %v586_v49 = vadd.f32 %v585_v38, %v571_v42  ;;  %v607_v5 = vadd.f32 %v1692_v8, %v1691_v61  ;;  %v608_v48 = vadd.f32 %v1694_v4, %v1693_v50 }
  0x96   : > { %v618_v56 = vadd.f32 %v617_v15, %v603_v39  ;;  %v609_v9 = vadd.f32 %v1410_v20, %v1695_v17  ;;  %v610_v12 = vadd.f32 %v1415_v36, %v1696_v3 }
  0x97   : > { %v554_v60 = vadd.f32 %v553_v55, %v538_v52  ;;  %v587_v58 = vadd.f32 %v586_v49, %v572_v0 }
  0x98   : > { %v619_v23 = vadd.f32 %v618_v56, %v604_v14 }
  0x99   : > { %v555_v54 = vadd.f32 %v554_v60, %v539_v1  ;;  %v588_v62 = vadd.f32 %v587_v58, %v573_v29 }
  0x9a   : > { %v620_v46 = vadd.f32 %v619_v23, %v605_v45 }
  0x9b   : > { %v589_v22 = vadd.f32 %v588_v62, %v574_v2  ;;  %557 = vst [vmem:[%s238_s19] sm:$0xff] %v555_v54 }
  0x9c   : > { %v621_v13 = vadd.f32 %v620_v46, %v606_v41 }
  0x9d   : > { %v590_v25 = vadd.f32 %v589_v22, %v575_v43 }
  0x9e   : > { %v622_v44 = vadd.f32 %v621_v13, %v607_v5 }
  0x9f   : > { %775 = vst [vmem:[%s238_s19 + $0x8] sm:$0xff] %v590_v25 }
  0xa0   : > { %v623_v59 = vadd.f32 %v622_v44, %v608_v48 }
  0xa2   : > { %v624_v7 = vadd.f32 %v623_v59, %v609_v9 }
  0xa4   : > { %v625_v26 = vadd.f32 %v624_v7, %v610_v12 }
  0xa6   : > { %777 = vst [vmem:[%s238_s19 + $0x10] sm:$0xff] %v625_v26 }
  0xa7   : > { %1022 = shalt.err (!%p1019_p7)
}
  0xa8   : > { %s1023_s27 = scalar_lea.hbm %s1567_s8, 384  ;;  %s1027_s20 = scalar_lea.hbm %s1619_s2, 768 }
  0xa9   : > { %p1024_p10 = scmp.ne.s32.totalorder %s1567_s8, %s1023_s27  ;;  %p1028_p3 = scmp.lt.s32.totalorder %s1567_s8, %s1619_s2 }
  0xaa   : > { %p1029_p8 = scmp.lt.s32.totalorder %s1027_s20, %s1023_s27 }
  0xab   : > { %p1025_p1 = pnand %p1024_p10, %p1168_p9 }
  0xac   : > { %p1030_p0 = por %p1029_p8, %p1028_p3 }
  0xad   : > { %p1026_p13 = pneg %p1025_p1 }
  0xaf   : > { %p1031_p2 = pnand %p1030_p0, %p1026_p13 }
  0xb1   : > { %1034 = shalt.err (!%p1031_p2)
}
  0xb2   : > { %s1100_s21 = smov 128   ;;  %s1101_s19 = smov 8  }
  0xb3   : > { %789 = dma.vmem_to_hbm [thread:$0]  (%p1168_p9), %s1569_s29, 384, %s1567_s8, %s629_s15, %s1100_s21, %s1100_s21, %s1101_s19  }
  0xb4 PF: > { %s659_s28 = sand.u32 1, %s1073_s9   ;;  %p799_p5 = pnand %p764_p12, %p1175_p11 }
  0xb5   : > { %s660_s3 = scalar_lea.sflag [#allocation4], %s659_s28 }
  0xb6   : > { %p800_p6 = pneg %p799_p5 }
  0xb8   : > { %1068 = dma.done.wait (%p800_p6), %s660_s3, 384  }
  0xb9   : > { %1070 = vsyncadd (%p800_p6), %s660_s3, 4294966912  ;;  %s21_s14 = sadd.s32 1, %s1093_s14   ;;  %s1697_s9 = smov %s1077_s10 }
  0xba   : > { %p18_p4 = scmp.ge.s32.totalorder %s21_s14, 4   ;;  %s1698_s10 = smov %s1081_s11 }
  0xbb   : > { %s1699_s11 = smov %s1173_s23  ;;  %s1700_s12 = smov %s1089_s13 }
  0xbc   : > { %s1701_s13 = smov %s1703_s17  ;;  %20 = sbr.rel (!%p18_p4) target bundleno = 8 (0x8), region = 92 }
  0xc1   :  { %665 = vsyncpa [#allocation3], 1 }
  0xc2   :  { %667 = vsyncpa [#allocation3 + $0x1], 1 }
  0xc3   :  { %668 = vsyncpa [#allocation6], 1 }
  0xc4   :  { %670 = vsyncpa [#allocation6 + $0x1], 1 }
  0xc5   :  { %671 = vsyncpa [#allocation4], 1 }
  0xc6   :  { %673 = vsyncpa [#allocation4 + $0x1], 1 }

</bundles_post_ra>
